<compile_context>
chip_gen: v5e
topology: v5e:2x2
jax: 0.10.0
libtpu: 0.0.40
codegen_flags: <defaults>
</compile_context>

<pallas_src>
import functools

import jax
import jax.numpy as jnp
from jax.experimental import pallas as pl
from jax.experimental.pallas import tpu as pltpu

_LANES = 128
_ACC_ROWS = 64   # 8 independent (8,128) f32 accumulation chains


def _cdiv(a, b):
    return -(-a // b)


def _round_up(a, b):
    return _cdiv(a, b) * b


def _auto_n_split():
    """2 grid slices on 2-TensorCore chips (v7x); 1 on single-TC v5e/v6e."""
    try:
        kind = jax.devices()[0].device_kind.lower()
    except Exception:
        return 1
    return 2 if ("v7" in kind or "7x" in kind) else 1


def _mse_partial_kernel(g_ref, c_ref, out_ref, acc_ref, *, block_rows,
                        tail_rows):
    i = pl.program_id(1)

    # Zero the per-slice accumulator at the start of each parallel slice.
    @pl.when(i == 0)
    def _():
        acc_ref[...] = jnp.zeros_like(acc_ref)

    g = g_ref[...]
    c = c_ref[...]
    if g.dtype != jnp.float32:            # static (trace-time) check
        g = g.astype(jnp.float32)
        c = c.astype(jnp.float32)
    d = g - c
    sq = d * d

    def accumulate(x):
        # (block_rows,128) -> (block_rows//64, 64, 128) is tile-preserving;
        # the leading-axis sum is pure VPU adds into 8 independent vreg
        # chains (~8x shorter dependency chain than a single (8,128) acc).
        acc_ref[...] += jnp.sum(
            x.reshape(block_rows // _ACC_ROWS, _ACC_ROWS, _LANES), axis=0)

    if tail_rows is None:
        accumulate(sq)
    else:
        # Only the single last real block holds rows past the logical end
        # (partial DMA tile -> undefined rows). Gate the iota/compare/select
        # mask to that block so every full block keeps the unmasked path.
        is_last = jnp.logical_and(
            pl.program_id(0) == pl.num_programs(0) - 1,
            i == pl.num_programs(1) - 1)

        @pl.when(is_last)
        def _():
            ridx = jax.lax.broadcasted_iota(jnp.int32, sq.shape, 0)
            accumulate(jnp.where(ridx < tail_rows, sq, 0.0))

        @pl.when(jnp.logical_not(is_last))
        def _():
            accumulate(sq)

    # Flush this slice's per-lane partial sums once, on its last step.
    @pl.when(i == pl.num_programs(1) - 1)
    def _():
        out_ref[...] = acc_ref[...]


def content_loss(gen, content, *, block_rows=8192, n_split=None):
    """Returns (gen, loss) where loss == mean((gen - content)**2)."""
    assert gen.shape == content.shape, "gen/content shape mismatch"
    total = int(gen.size)
    assert total > 0

    if n_split is None:
        n_split = _auto_n_split()

    g = gen.reshape(-1)
    c = content.reshape(-1)
    lane_pad = (-total) % _LANES
    if lane_pad:
        # Rare path (element count not a multiple of 128): one minimal zero
        # pad. Identical zero padding on both inputs contributes 0 to the sum.
        g = jnp.pad(g, (0, lane_pad))
        c = jnp.pad(c, (0, lane_pad))
    rows = (total + lane_pad) // _LANES
    g2 = g.reshape(rows, _LANES)
    c2 = c.reshape(rows, _LANES)

    # Block rows: multiple of _ACC_ROWS=64 (which also covers packed-sublane
    # tiling for bf16/int8 inputs), capped at `block_rows`, never much larger
    # than the data itself.
    br_cap = _round_up(max(int(block_rows), _ACC_ROWS), _ACC_ROWS)
    br = min(br_cap, _round_up(rows, _ACC_ROWS))
    n_blocks = _cdiv(rows, br)

    # TensorCore split (leading "parallel" grid axis).
    n_par = n_split if (n_split > 1 and n_blocks >= n_split) else 1
    if n_par > 1 and n_blocks % n_par:
        # Shrink blocks so they split evenly across cores: no phantom blocks,
        # no duplicate HBM reads, balanced DMA per TensorCore.
        m = _round_up(n_blocks, n_par)
        br2 = _round_up(_cdiv(rows, m), _ACC_ROWS)
        if _cdiv(rows, br2) % n_par == 0:
            br = br2
            n_blocks = _cdiv(rows, br)
        else:
            n_par = 1        # tiny ragged case: serialize, no wasted reads
    bpp = n_blocks // n_par                       # blocks per grid slice

    covered = n_blocks * br
    # Valid rows inside the (single) last block, or None if no tail exists.
    tail_rows = None if covered == rows else rows - (n_blocks - 1) * br

    kernel = functools.partial(_mse_partial_kernel, block_rows=br,
                               tail_rows=tail_rows)

    def in_idx(p, i):
        return (p * bpp + i, 0)

    partials = pl.pallas_call(
        kernel,
        out_shape=jax.ShapeDtypeStruct((n_par * _ACC_ROWS, _LANES),
                                       jnp.float32),
        grid_spec=pltpu.PrefetchScalarGridSpec(
            num_scalar_prefetch=0,
            grid=(n_par, bpp),
            in_specs=[
                pl.BlockSpec((br, _LANES), in_idx),
                pl.BlockSpec((br, _LANES), in_idx),
            ],
            out_specs=pl.BlockSpec((_ACC_ROWS, _LANES), lambda p, i: (p, 0)),
            scratch_shapes=[pltpu.VMEM((_ACC_ROWS, _LANES), jnp.float32)],
        ),
        compiler_params=pltpu.CompilerParams(
            dimension_semantics=("parallel", "arbitrary"),
            # 4 MiB/tile x 2 inputs x 2 buffers = 16 MiB of double-buffered
            # input tiles at the default 8192-row f32 block; 32 MiB keeps
            # headroom and fits every generation (incl. v7x's 64 MiB VMEM).
            vmem_limit_bytes=32 * 1024 * 1024,
        ),
    )(g2, c2)

    # Single cross-lane reduction over a tiny (n_par*64, 128) array + scale.
    loss = jnp.sum(partials) * jnp.float32(1.0 / total)
    # forward() returns the generated image unchanged (pass-through).
    return gen, loss


if __name__ == "__main__":
    key = jax.random.PRNGKey(0)
    k_gen, k_content = jax.random.split(key)

    # NCHW, small shapes: batch=2, channels=4, spatial=16x16.
    gen = jax.random.normal(k_gen, (2, 4, 16, 16), dtype=jnp.float32)
    content = jax.random.normal(k_content, (2, 4, 16, 16), dtype=jnp.float32)

    out, loss = content_loss(gen, content)
    jax.block_until_ready((out, loss))

    # Correctness vs pure-JAX reference (== F.mse_loss default 'mean').
    ref_loss = jnp.mean((gen - content) ** 2)
    assert jnp.allclose(loss, ref_loss, rtol=1e-5, atol=1e-6), (loss, ref_loss)
    assert jnp.array_equal(out, gen)

    keys = jax.random.split(key, 10)

    # Even 2-way split, multi-block per slice, no tail (256 rows / 64-row br).
    a1 = jax.random.normal(keys[0], (2, 16, 32, 32), dtype=jnp.float32)
    b1 = jax.random.normal(keys[1], (2, 16, 32, 32), dtype=jnp.float32)
    _, l1 = content_loss(a1, b1, block_rows=64, n_split=2)
    assert jnp.allclose(l1, jnp.mean((a1 - b1) ** 2), rtol=1e-5, atol=1e-6)

    # 2-way split with a ragged tail in the last block (72 rows).
    a2 = jax.random.normal(keys[2], (2, 8, 24, 24), dtype=jnp.float32)
    b2 = jax.random.normal(keys[3], (2, 8, 24, 24), dtype=jnp.float32)
    _, l2 = content_loss(a2, b2, block_rows=16, n_split=2)
    assert jnp.allclose(l2, jnp.mean((a2 - b2) ** 2), rtol=1e-5, atol=1e-6)

    # Odd block count -> block size re-derived for an even split (1536 rows,
    # 512-row cap -> 4 blocks of 384 rows across 2 slices).
    a3 = jax.random.normal(keys[4], (3, 16, 64, 64), dtype=jnp.float32)
    b3 = jax.random.normal(keys[5], (3, 16, 64, 64), dtype=jnp.float32)
    _, l3 = content_loss(a3, b3, block_rows=512, n_split=2)
    assert jnp.allclose(l3, jnp.mean((a3 - b3) ** 2), rtol=1e-5, atol=1e-6)

    # Element count not a multiple of 128 (lane-padding path).
    a4 = jax.random.normal(keys[6], (2, 3, 5, 7), dtype=jnp.float32)
    b4 = jax.random.normal(keys[7], (2, 3, 5, 7), dtype=jnp.float32)
    _, l4 = content_loss(a4, b4)
    assert jnp.allclose(l4, jnp.mean((a4 - b4) ** 2), rtol=1e-5, atol=1e-6)

    # bf16 inputs (cast to f32 inside the kernel, f32 accumulation).
    a5 = jax.random.normal(keys[8], (2, 8, 32, 32), dtype=jnp.bfloat16)
    b5 = jax.random.normal(keys[9], (2, 8, 32, 32), dtype=jnp.bfloat16)
    _, l5 = content_loss(a5, b5)
    ref5 = jnp.mean((a5.astype(jnp.float32) - b5.astype(jnp.float32)) ** 2)
    assert jnp.allclose(l5, ref5, rtol=1e-4, atol=1e-6)

    jax.block_until_ready((l1, l2, l3, l4, l5))
    print("KERNEL_OK")
</pallas_src>

<mosaic_0001>
module attributes {stable_mosaic.version = 11 : i64} {
  func.func @_mse_partial_kernel(%arg0: i32, %arg1: i32, %arg2: memref<64x128xf32, #tpu.memory_space<vmem>>, %arg3: memref<64x128xf32, #tpu.memory_space<vmem>>, %arg4: memref<64x128xf32, #tpu.memory_space<vmem>>, %arg5: memref<64x128xf32, #tpu.memory_space<vmem>>) attributes {dimension_semantics = [#tpu.dimension_semantics<parallel>, #tpu.dimension_semantics<arbitrary>], iteration_bounds = array<i64: 1, 1>, scalar_prefetch = 0 : i64, scratch_operands = 1 : i64, tpu.core_type = #tpu.core_type<tc>, window_params = [{transform_indices = @transform_0, window_bounds = array<i64: 64, 128>}, {transform_indices = @transform_1, window_bounds = array<i64: 64, 128>}, {transform_indices = @transform_2, window_bounds = array<i64: 64, 128>}]} {
    %c0_i32 = arith.constant 0 : i32
    %0 = arith.cmpi eq, %arg1, %c0_i32 : i32
    %1 = arith.extui %0 : i1 to i32
    %c0_i32_0 = arith.constant 0 : i32
    %2 = arith.cmpi ne, %1, %c0_i32_0 : i32
    scf.if %2 {
      %cst = arith.constant 0.000000e+00 : f32
      %18 = vector.broadcast %cst : f32 to vector<64x128xf32>
      %c0_10 = arith.constant 0 : index
      %c0_11 = arith.constant 0 : index
      %19 = vector.load %arg5[%c0_10, %c0_11] : memref<64x128xf32, #tpu.memory_space<vmem>>, vector<64x128xf32>
      tpu.vector_store %arg5[%c0_10, %c0_11], %18 {strides = array<i32>} : memref<64x128xf32, #tpu.memory_space<vmem>>, vector<64x128xf32>,
    } else {
    }
    %c0 = arith.constant 0 : index
    %c0_1 = arith.constant 0 : index
    %3 = vector.load %arg2[%c0, %c0_1] : memref<64x128xf32, #tpu.memory_space<vmem>>, vector<64x128xf32>
    %c0_2 = arith.constant 0 : index
    %c0_3 = arith.constant 0 : index
    %4 = vector.load %arg3[%c0_2, %c0_3] : memref<64x128xf32, #tpu.memory_space<vmem>>, vector<64x128xf32>
    %5 = arith.subf %3, %4 : vector<64x128xf32>
    %6 = arith.mulf %5, %5 : vector<64x128xf32>
    %c0_i32_4 = arith.constant 0 : i32
    %7 = arith.cmpi eq, %arg0, %c0_i32_4 : i32
    %c0_i32_5 = arith.constant 0 : i32
    %8 = arith.cmpi eq, %arg1, %c0_i32_5 : i32
    %9 = arith.andi %7, %8 : i1
    %10 = arith.extui %9 : i1 to i32
    %c0_i32_6 = arith.constant 0 : i32
    %11 = arith.cmpi ne, %10, %c0_i32_6 : i32
    scf.if %11 {
      %18 = tpu.iota {dimensions = array<i32: 0>} : vector<64x128xi32>
      %c16_i32 = arith.constant 16 : i32
      %19 = vector.broadcast %c16_i32 : i32 to vector<64x128xi32>
      %20 = arith.cmpi slt, %18, %19 : vector<64x128xi32>
      %cst = arith.constant 0.000000e+00 : f32
      %21 = vector.broadcast %cst : f32 to vector<64x128xf32>
      %22 = arith.select %20, %6, %21 : vector<64x128xi1>, vector<64x128xf32>
      %c0_10 = arith.constant 0 : index
      %c0_11 = arith.constant 0 : index
      %23 = vector.load %arg5[%c0_10, %c0_11] : memref<64x128xf32, #tpu.memory_space<vmem>>, vector<64x128xf32>
      %24 = vector.shape_cast %22 : vector<64x128xf32> to vector<1x64x128xf32>
      %cst_12 = arith.constant dense<0.000000e+00> : vector<64x128xf32>
      %25 = vector.multi_reduction <add>, %24, %cst_12 [0] : vector<1x64x128xf32> to vector<64x128xf32>
      %26 = arith.addf %23, %25 : vector<64x128xf32>
      %c0_13 = arith.constant 0 : index
      %c0_14 = arith.constant 0 : index
      %27 = vector.load %arg5[%c0_13, %c0_14] : memref<64x128xf32, #tpu.memory_space<vmem>>, vector<64x128xf32>
      tpu.vector_store %arg5[%c0_13, %c0_14], %26 {strides = array<i32>} : memref<64x128xf32, #tpu.memory_space<vmem>>, vector<64x128xf32>,
    } else {
    }
    %true = arith.constant true
    %12 = arith.xori %9, %true : i1
    %13 = arith.extui %12 : i1 to i32
    %c0_i32_7 = arith.constant 0 : i32
    %14 = arith.cmpi ne, %13, %c0_i32_7 : i32
    scf.if %14 {
      %c0_10 = arith.constant 0 : index
      %c0_11 = arith.constant 0 : index
      %18 = vector.load %arg5[%c0_10, %c0_11] : memref<64x128xf32, #tpu.memory_space<vmem>>, vector<64x128xf32>
      %19 = vector.shape_cast %6 : vector<64x128xf32> to vector<1x64x128xf32>
      %cst = arith.constant dense<0.000000e+00> : vector<64x128xf32>
      %20 = vector.multi_reduction <add>, %19, %cst [0] : vector<1x64x128xf32> to vector<64x128xf32>
      %21 = arith.addf %18, %20 : vector<64x128xf32>
      %c0_12 = arith.constant 0 : index
      %c0_13 = arith.constant 0 : index
      %22 = vector.load %arg5[%c0_12, %c0_13] : memref<64x128xf32, #tpu.memory_space<vmem>>, vector<64x128xf32>
      tpu.vector_store %arg5[%c0_12, %c0_13], %21 {strides = array<i32>} : memref<64x128xf32, #tpu.memory_space<vmem>>, vector<64x128xf32>,
    } else {
    }
    %c0_i32_8 = arith.constant 0 : i32
    %15 = arith.cmpi eq, %arg1, %c0_i32_8 : i32
    %16 = arith.extui %15 : i1 to i32
    %c0_i32_9 = arith.constant 0 : i32
    %17 = arith.cmpi ne, %16, %c0_i32_9 : i32
    scf.if %17 {
      %c0_10 = arith.constant 0 : index
      %c0_11 = arith.constant 0 : index
      %18 = vector.load %arg5[%c0_10, %c0_11] : memref<64x128xf32, #tpu.memory_space<vmem>>, vector<64x128xf32>
      %c0_12 = arith.constant 0 : index
      %c0_13 = arith.constant 0 : index
      %19 = vector.load %arg4[%c0_12, %c0_13] : memref<64x128xf32, #tpu.memory_space<vmem>>, vector<64x128xf32>
      tpu.vector_store %arg4[%c0_12, %c0_13], %18 {strides = array<i32>} : memref<64x128xf32, #tpu.memory_space<vmem>>, vector<64x128xf32>,
    } else {
    }
    return
  }
  func.func @transform_0(%arg0: i32, %arg1: i32) -> (i32, i32) {
    %c1_i32 = arith.constant 1 : i32
    %0 = arith.muli %arg0, %c1_i32 : i32
    %1 = arith.addi %0, %arg1 : i32
    %c0_i32 = arith.constant 0 : i32
    %c0_i32_0 = arith.constant 0 : i32
    return %1, %c0_i32 : i32, i32
  }
  func.func @transform_1(%arg0: i32, %arg1: i32) -> (i32, i32) {
    %c1_i32 = arith.constant 1 : i32
    %0 = arith.muli %arg0, %c1_i32 : i32
    %1 = arith.addi %0, %arg1 : i32
    %c0_i32 = arith.constant 0 : i32
    %c0_i32_0 = arith.constant 0 : i32
    return %1, %c0_i32 : i32, i32
  }
  func.func @transform_2(%arg0: i32, %arg1: i32) -> (i32, i32) {
    %c0_i32 = arith.constant 0 : i32
    %c0_i32_0 = arith.constant 0 : i32
    return %arg0, %c0_i32 : i32, i32
  }
}

</mosaic_0001>

<bundles_post_ra>
// kernel: tpu_custom_call.1
= control target key start
LH: loop header
LB: loop body
LE: loop exit
PB: predicated region body
PF: predicated region fallthrough
CT: control target
= control target key end

     0   :  { %7 = vsyncpa [#allocation4], 0  ;;  %s373_s0 = inlined_call_operand.hbm [shape: f32[16,128], index: 0, kind: input, shape index: {}]   ;;  %s374_s1 = inlined_call_operand.hbm [shape: f32[16,128], index: 1, kind: input, shape index: {}]   ;;  %s375_s2 = inlined_call_operand.hbm [shape: f32[64,128], index: 2, kind: output, shape index: {}]  }
   0x1   :  { %8 = vsyncpa [#allocation7], 0 }
   0x2   :  { %9 = vsyncpa [#allocation5], 0 }
   0x3   :  { %18 = vsyncadd [#allocation4], 768  ;;  %s23_s11 = sshll.u32 %s373_s0, 4  ;;  %s334_s12 = smov [#allocation3]   ;;  %s24_s11 = int_to_ptr.hbm [resolvable:$true] %s23_s11 }
   0x4   :  { %s25_s13 = sshll.u32 %s334_s12, 4  ;;  %s335_s14 = smov 128   ;;  %s26_s13 = int_to_ptr.vmem [resolvable:$true] %s25_s13 }
   0x5   :  { %s336_s15 = smov 8  }
   0x6   :  { %31 = dma.hbm_to_vmem [thread:$0]  %s24_s11, 256, %s26_s13, [#allocation4], %s335_s14, %s335_s14, %s336_s15  }
   0x7   :  { %40 = vsyncadd [#allocation7], 768  ;;  %s45_s18 = sshll.u32 %s374_s1, 4  ;;  %s337_s19 = smov [#allocation6]   ;;  %s46_s18 = int_to_ptr.hbm [resolvable:$true] %s45_s18 }
   0x8   :  { %s47_s20 = sshll.u32 %s337_s19, 4  ;;  %s48_s20 = int_to_ptr.vmem [resolvable:$true] %s47_s20 }
   0x9   :  { %53 = dma.hbm_to_vmem [thread:$0]  %s46_s18, 256, %s48_s20, [#allocation7], %s335_s14, %s335_s14, %s336_s15  }
   0xa   :  { %328 = dma.done.wait [#allocation4], 1024  }
   0xb   :  { %329 = vsyncadd [#allocation4], 4294966272 }
   0xc   :  { %330 = dma.done.wait [#allocation7], 1024  }
   0xd   :  { %331 = vsyncadd [#allocation7], 4294966272  ;;  %v338_v0 = vmov 0.0   ;;  %v82_v1 = vld [vmem:[#allocation3] sm:$0xff]  ;;  %v83_v3 = vld [vmem:[#allocation3 + $0x8] sm:$0xff]  ;;  %s339_s0 = smov [#allocation8]  }
   0xe   :  { %224 = vst [vmem:[#allocation8 + $0x10] sm:$0xff] %v338_v0  ;;  %v90_v2 = vld [vmem:[#allocation6] sm:$0xff]  ;;  %v91_v5 = vld [vmem:[#allocation6 + $0x8] sm:$0xff]  ;;  %s234_s1 = sshll.u32 %s339_s0, 4  ;;  %s236_s23 = sshll.u32 %s375_s2, 4  ;;  %s235_s1 = int_to_ptr.vmem [resolvable:$true] %s234_s1  ;;  %s237_s23 = int_to_ptr.hbm [resolvable:$true] %s236_s23 }
   0xf   :  { %225 = vst [vmem:[#allocation8 + $0x18] sm:$0xff] %v338_v0  ;;  %v98_v4 = vsub.f32 %v82_v1, %v90_v2  ;;  %v99_v6 = vsub.f32 %v83_v3, %v91_v5 }
  0x10   :  { %226 = vst [vmem:[#allocation8 + $0x20] sm:$0xff] %v338_v0 }
  0x11   :  { %227 = vst [vmem:[#allocation8 + $0x28] sm:$0xff] %v338_v0  ;;  %v106_v7 = vmul.f32 %v98_v4, %v98_v4  ;;  %v107_v8 = vmul.f32 %v99_v6, %v99_v6 }
  0x12   :  { %228 = vst [vmem:[#allocation8 + $0x30] sm:$0xff] %v338_v0 }
  0x13   :  { %229 = vst [vmem:[#allocation8 + $0x38] sm:$0xff] %v338_v0 }
  0x14   :  { %222 = vst [vmem:[#allocation8] sm:$0xff] %v106_v7 }
  0x15   :  { %223 = vst [vmem:[#allocation8 + $0x8] sm:$0xff] %v107_v8 }
  0x16   :  { %242 = dma.vmem_to_hbm [thread:$0]  %s235_s1, 1024, %s237_s23, [#allocation5], %s335_s14, %s335_s14, %s336_s15  }
  0x17   :  { %332 = dma.done.wait [#allocation5], 1024  }
  0x18   :  { %333 = vsyncadd [#allocation5], 4294966272 }
  0x19   :  { %247 = vsyncpa [#allocation4], 1 }
  0x1a   :  { %248 = vsyncpa [#allocation7], 1 }
  0x1b   :  { %249 = vsyncpa [#allocation5], 1 }

</bundles_post_ra>
